<compile_context>
chip_gen: v7x
topology: tpu7x:2x2x1
jax: 0.10.0
libtpu: 0.0.40
codegen_flags: <defaults>
</compile_context>

<pallas_src>
import numpy as np
import jax
import jax.numpy as jnp
from jax.experimental import pallas as pl
from jax.experimental.pallas import tpu as pltpu

LANES = 128
SUBLANES = 8
BLOCK_BYTES_PER_INPUT = 4 * 1024 * 1024   # ~4 MiB per input per grid step
MIN_BLOCKS = 4                            # keep the parallel axis shardable


def _round_up(x, m):
    return -(-x // m) * m


def _round_down(x, m):
    return (x // m) * m


def _make_masked_l1_kernel(tr, rows, ragged):
    """Kernel factory: (tr, 128) block -> (2, 8, 128) partial sums."""
    n_tiles = tr // SUBLANES

    def kernel(pred_ref, target_ref, out_ref):
        t = target_ref[...].astype(jnp.float32)          # (tr, 128)
        p = pred_ref[...].astype(jnp.float32)            # (tr, 128)

        valid = t > 0.0                                   # bool predicate, used once
        if ragged:
            # Mask the Pallas-padded tail of the ragged last block: data beyond
            # the real `rows` rows is unspecified and must not contribute.
            row_ids = (jax.lax.broadcasted_iota(jnp.int32, (tr, LANES), 0)
                       + pl.program_id(0) * tr)
            valid = jnp.logical_and(valid, row_ids < rows)

        absdiff = jnp.where(valid, jnp.abs(t - p), 0.0)   # select, no NaN leak
        cnt = valid.astype(jnp.float32)

        # Layout-preserving sublane regroup; axis-0 sum is pure VALU adds.
        out_ref[0, :, :] = absdiff.reshape(n_tiles, SUBLANES, LANES).sum(axis=0)
        out_ref[1, :, :] = cnt.reshape(n_tiles, SUBLANES, LANES).sum(axis=0)

    return kernel


def masked_l1_loss(pred, target):
    """JAX/Pallas equivalent of MaskedL1Loss.forward(pred, target)."""
    assert pred.ndim == target.ndim, "inconsistent dimensions"
    assert pred.shape == target.shape, "inconsistent dimensions"

    total = int(np.prod(pred.shape))
    p_flat = pred.reshape(-1)
    t_flat = target.reshape(-1)

    it_p = jnp.dtype(pred.dtype).itemsize
    it_t = jnp.dtype(target.dtype).itemsize
    # Packed-sublane multiple: 8 (f32), 16 (bf16), 32 (int8).
    sub_mult = SUBLANES * max(1, 4 // min(it_p, it_t))

    # Pad flat arrays only to a multiple of 128 lanes (<=127 zero elements).
    # Zero-padded target -> (target > 0) is False -> padding contributes nothing.
    pad_flat = (-total) % LANES
    if pad_flat:
        p_flat = jnp.concatenate([p_flat, jnp.zeros((pad_flat,), p_flat.dtype)])
        t_flat = jnp.concatenate([t_flat, jnp.zeros((pad_flat,), t_flat.dtype)])
    rows = (total + pad_flat) // LANES

    p2 = p_flat.reshape(rows, LANES)
    t2 = t_flat.reshape(rows, LANES)

    # Degenerate tiny inputs: pad rows up to one packed-sublane tile (tiny copy)
    # so the block never exceeds the array extent.
    if rows < sub_mult:
        extra = sub_mult - rows
        p2 = jnp.concatenate([p2, jnp.zeros((extra, LANES), p2.dtype)], axis=0)
        t2 = jnp.concatenate([t2, jnp.zeros((extra, LANES), t2.dtype)], axis=0)
        rows = sub_mult

    # Block rows: ~4 MiB per input per step, packed-sublane aligned, <= rows.
    itemsize = max(it_p, it_t)
    tr = _round_down(max(BLOCK_BYTES_PER_INPUT // (LANES * itemsize), sub_mult),
                     sub_mult)
    tr = max(tr, sub_mult)
    tr = min(tr, _round_down(rows, sub_mult))
    # Keep at least MIN_BLOCKS grid steps for large inputs (v7x 2-TC sharding).
    if rows >= MIN_BLOCKS * sub_mult:
        tr = min(tr, max(sub_mult, _round_down(rows // MIN_BLOCKS, sub_mult)))

    num_blocks = pl.cdiv(rows, tr)
    ragged = (rows % tr) != 0   # static: iota tail-mask only emitted when needed

    kernel = _make_masked_l1_kernel(tr, rows, ragged)

    cost = pl.CostEstimate(
        flops=6 * rows * LANES,
        transcendentals=0,
        bytes_accessed=rows * LANES * (it_p + it_t)
        + num_blocks * 2 * SUBLANES * LANES * 4,
    )

    out = pl.pallas_call(
        kernel,
        out_shape=jax.ShapeDtypeStruct((num_blocks, 2, SUBLANES, LANES),
                                       jnp.float32),
        grid_spec=pltpu.PrefetchScalarGridSpec(
            num_scalar_prefetch=0,
            grid=(num_blocks,),
            in_specs=[
                pl.BlockSpec((tr, LANES), lambda i: (i, 0)),
                pl.BlockSpec((tr, LANES), lambda i: (i, 0)),
            ],
            out_specs=pl.BlockSpec((None, 2, SUBLANES, LANES),
                                   lambda i: (i, 0, 0, 0)),
        ),
        compiler_params=pltpu.CompilerParams(
            dimension_semantics=("parallel",),   # independent partial sums
            vmem_limit_bytes=48 * 1024 * 1024,   # headroom on all generations
        ),
        cost_estimate=cost,
    )(p2, t2)

    # Tiny finalize in plain JAX: sum the per-block (8,128) partials, divide.
    abs_sum = jnp.sum(out[:, 0])
    valid_cnt = jnp.sum(out[:, 1])
    return abs_sum / valid_cnt


def _masked_l1_reference(pred, target):
    """Pure-JAX reference matching the PyTorch module."""
    mask = (target > 0).astype(jnp.float32)
    diff = jnp.abs(target - pred) * mask
    return jnp.sum(diff) / jnp.sum(mask)


if __name__ == "__main__":
    key = jax.random.PRNGKey(0)
    k1, k2, k3, k4 = jax.random.split(key, 4)

    # Main check: (2, 4, 16, 16) — total is a multiple of 128 (no padding).
    pred = jax.random.uniform(k1, (2, 4, 16, 16), dtype=jnp.float32)
    target = jax.random.normal(k2, (2, 4, 16, 16), dtype=jnp.float32)
    out = jax.block_until_ready(masked_l1_loss(pred, target))
    ref = jax.block_until_ready(_masked_l1_reference(pred, target))
    assert np.allclose(np.asarray(out), np.asarray(ref), rtol=1e-5, atol=1e-6), (
        f"mismatch: pallas={float(out)} ref={float(ref)}")

    # Ragged check: total % 128 != 0 and rows % tr != 0 — exercises the
    # <=127-element flat pad plus the in-kernel iota tail mask.
    pred2 = jax.random.uniform(k3, (3, 5, 7, 11), dtype=jnp.float32)
    target2 = jax.random.normal(k4, (3, 5, 7, 11), dtype=jnp.float32)
    out2 = jax.block_until_ready(masked_l1_loss(pred2, target2))
    ref2 = jax.block_until_ready(_masked_l1_reference(pred2, target2))
    assert np.allclose(np.asarray(out2), np.asarray(ref2), rtol=1e-5, atol=1e-6), (
        f"mismatch (ragged): pallas={float(out2)} ref={float(ref2)}")

    print("KERNEL_OK")
</pallas_src>

<mosaic_0001>
module attributes {stable_mosaic.version = 11 : i64} {
  func.func @kernel(%arg0: i32, %arg1: memref<16x128xf32, #tpu.memory_space<vmem>>, %arg2: memref<16x128xf32, #tpu.memory_space<vmem>>, %arg3: memref<1x2x8x128xf32, #tpu.memory_space<vmem>>) attributes {dimension_semantics = [#tpu.dimension_semantics<parallel>], iteration_bounds = array<i64: 1>, scalar_prefetch = 0 : i64, scratch_operands = 0 : i64, tpu.core_type = #tpu.core_type<tc>, window_params = [{transform_indices = @transform_0, window_bounds = array<i64: 16, 128>}, {transform_indices = @transform_1, window_bounds = array<i64: 16, 128>}, {transform_indices = @transform_2, window_bounds = array<i64: 1, 2, 8, 128>}]} {
    %c0 = arith.constant 0 : index
    %c0_0 = arith.constant 0 : index
    %0 = vector.load %arg2[%c0, %c0_0] : memref<16x128xf32, #tpu.memory_space<vmem>>, vector<16x128xf32>
    %c0_1 = arith.constant 0 : index
    %c0_2 = arith.constant 0 : index
    %1 = vector.load %arg1[%c0_1, %c0_2] : memref<16x128xf32, #tpu.memory_space<vmem>>, vector<16x128xf32>
    %cst = arith.constant 0.000000e+00 : f32
    %2 = vector.broadcast %cst : f32 to vector<16x128xf32>
    %3 = arith.cmpf ogt, %0, %2 : vector<16x128xf32>
    %4 = arith.subf %0, %1 : vector<16x128xf32>
    %5 = math.absf %4 : vector<16x128xf32>
    %cst_3 = arith.constant 0.000000e+00 : f32
    %6 = vector.broadcast %cst_3 : f32 to vector<16x128xf32>
    %7 = arith.select %3, %5, %6 : vector<16x128xi1>, vector<16x128xf32>
    %8 = arith.extui %3 : vector<16x128xi1> to vector<16x128xi32>
    %9 = arith.sitofp %8 : vector<16x128xi32> to vector<16x128xf32>
    %10 = vector.shape_cast %7 : vector<16x128xf32> to vector<2x8x128xf32>
    %cst_4 = arith.constant dense<0.000000e+00> : vector<8x128xf32>
    %11 = vector.multi_reduction <add>, %10, %cst_4 [0] : vector<2x8x128xf32> to vector<8x128xf32>
    %c0_5 = arith.constant 0 : index
    %c0_6 = arith.constant 0 : index
    %c0_7 = arith.constant 0 : index
    %c0_8 = arith.constant 0 : index
    %12 = vector.load %arg3[%c0_5, %c0_6, %c0_7, %c0_8] : memref<1x2x8x128xf32, #tpu.memory_space<vmem>>, vector<1x1x8x128xf32>
    %13 = vector.shape_cast %12 : vector<1x1x8x128xf32> to vector<8x128xf32>
    %14 = vector.shape_cast %11 : vector<8x128xf32> to vector<1x1x8x128xf32>
    tpu.vector_store %arg3[%c0_5, %c0_6, %c0_7, %c0_8], %14 {strides = array<i32>} : memref<1x2x8x128xf32, #tpu.memory_space<vmem>>, vector<1x1x8x128xf32>,
    %15 = vector.shape_cast %9 : vector<16x128xf32> to vector<2x8x128xf32>
    %cst_9 = arith.constant dense<0.000000e+00> : vector<8x128xf32>
    %16 = vector.multi_reduction <add>, %15, %cst_9 [0] : vector<2x8x128xf32> to vector<8x128xf32>
    %c0_10 = arith.constant 0 : index
    %c1 = arith.constant 1 : index
    %c0_11 = arith.constant 0 : index
    %c0_12 = arith.constant 0 : index
    %17 = vector.load %arg3[%c0_10, %c1, %c0_11, %c0_12] : memref<1x2x8x128xf32, #tpu.memory_space<vmem>>, vector<1x1x8x128xf32>
    %18 = vector.shape_cast %17 : vector<1x1x8x128xf32> to vector<8x128xf32>
    %19 = vector.shape_cast %16 : vector<8x128xf32> to vector<1x1x8x128xf32>
    tpu.vector_store %arg3[%c0_10, %c1, %c0_11, %c0_12], %19 {strides = array<i32>} : memref<1x2x8x128xf32, #tpu.memory_space<vmem>>, vector<1x1x8x128xf32>,
    return
  }
  func.func @transform_0(%arg0: i32) -> (i32, i32) {
    %c0_i32 = arith.constant 0 : i32
    %c0_i32_0 = arith.constant 0 : i32
    return %arg0, %c0_i32 : i32, i32
  }
  func.func @transform_1(%arg0: i32) -> (i32, i32) {
    %c0_i32 = arith.constant 0 : i32
    %c0_i32_0 = arith.constant 0 : i32
    return %arg0, %c0_i32 : i32, i32
  }
  func.func @transform_2(%arg0: i32) -> (i32, i32, i32, i32) {
    %c0_i32 = arith.constant 0 : i32
    %c0_i32_0 = arith.constant 0 : i32
    %c0_i32_1 = arith.constant 0 : i32
    %c0_i32_2 = arith.constant 0 : i32
    return %arg0, %c0_i32, %c0_i32_0, %c0_i32_1 : i32, i32, i32, i32
  }
}

</mosaic_0001>

<bundles_post_ra>
// kernel: tpu_custom_call.1
= control target key start
LH: loop header
LB: loop body
LE: loop exit
PB: predicated region body
PF: predicated region fallthrough
CT: control target
= control target key end

     0   :  { %7 = vsyncpa [#allocation3], 0  ;;  %s225_s0 = inlined_call_operand.hbm [shape: f32[16,128], index: 0, kind: input, shape index: {}]   ;;  %s226_s1 = inlined_call_operand.hbm [shape: f32[16,128], index: 1, kind: input, shape index: {}]   ;;  %s227_s2 = inlined_call_operand.hbm [shape: f32[1,2,8,128], index: 2, kind: output, shape index: {}]  }
   0x1   :  { %8 = vsyncpa [#allocation6], 0 }
   0x2   :  { %9 = vsyncpa [#allocation4], 0  ;;  %s159_s9 = smov [#allocation2]   ;;  %s87_s13 = scalar_lea.hbm %s225_s0, 256 }
   0x3   :  { %s15_s10 = sshll.u32 %s159_s9, 4  ;;  %p88_p0 = scmp.ne.s32.totalorder %s225_s0, %s87_s13  ;;  %s16_s10 = int_to_ptr.vmem [resolvable:$true] %s15_s10 }
   0x4   :  { %p91_p1 = scmp.lt.u32.totalorder %s87_s13, %s225_s0 }
   0x6   :  { %p93_p2 = pnand %p91_p1, %p88_p0 }
   0x8   :  { %96 = shalt.err (!%p93_p2)
}
   0x9   :  { %s97_s18 = scalar_lea.vmem %s16_s10, 256  ;;  %p102_p4 = scmp.lt.s32.totalorder %s16_s10, %s16_s10 }
   0xa   :  { %p98_p3 = scmp.ne.s32.totalorder %s16_s10, %s97_s18  ;;  %p103_p5 = scmp.lt.s32.totalorder %s97_s18, %s97_s18 }
   0xc   :  { %p104_p6 = por %p103_p5, %p102_p4 }
   0xe   :  { %p105_p7 = pnand %p104_p6, %p98_p3 }
  0x10   :  { %108 = shalt.err (!%p105_p7)
}
  0x11   :  { %s160_s19 = smov 128   ;;  %s161_s20 = smov 8  }
  0x12   :  { %21 = dma.hbm_to_vmem [thread:$0]  %s225_s0, 256, %s16_s10, [#allocation3], %s160_s19, %s160_s19, %s161_s20  }
  0x13   :  { %s162_s23 = smov [#allocation5]   ;;  %s109_s27 = scalar_lea.hbm %s226_s1, 256 }
  0x14   :  { %s27_s24 = sshll.u32 %s162_s23, 4  ;;  %p110_p8 = scmp.ne.s32.totalorder %s226_s1, %s109_s27  ;;  %s28_s24 = int_to_ptr.vmem [resolvable:$true] %s27_s24 }
  0x15   :  { %p113_p9 = scmp.lt.u32.totalorder %s109_s27, %s226_s1 }
  0x17   :  { %p115_p10 = pnand %p113_p9, %p110_p8 }
  0x19   :  { %118 = shalt.err (!%p115_p10)
}
  0x1a   :  { %s119_s4 = scalar_lea.vmem %s28_s24, 256  ;;  %p124_p12 = scmp.lt.s32.totalorder %s28_s24, %s28_s24 }
  0x1b   :  { %p120_p11 = scmp.ne.s32.totalorder %s28_s24, %s119_s4  ;;  %p125_p13 = scmp.lt.s32.totalorder %s119_s4, %s119_s4 }
  0x1d   :  { %p126_p0 = por %p125_p13, %p124_p12 }
  0x1f   :  { %p127_p1 = pnand %p126_p0, %p120_p11 }
  0x21   :  { %130 = shalt.err (!%p127_p1)
}
  0x22   :  { %33 = dma.hbm_to_vmem [thread:$0]  %s226_s1, 256, %s28_s24, [#allocation6], %s160_s19, %s160_s19, %s161_s20  }
  0x23   :  { %153 = dma.done.wait [#allocation3], 256  }
  0x24   :  { %154 = vsyncadd [#allocation3], 4294967040 }
  0x25   :  { %155 = dma.done.wait [#allocation6], 256  }
  0x26   :  { %156 = vsyncadd [#allocation6], 4294967040  ;;  %v40_v0 = vld [vmem:[#allocation5] sm:$0xff]  ;;  %v41_v1 = vld [vmem:[#allocation5 + $0x8] sm:$0xff]  ;;  %v163_v6 = vmov 0.0   ;;  %s164_s6 = smov [#allocation7]  }
  0x27   :  { %v42_v2 = vld [vmem:[#allocation2] sm:$0xff]  ;;  %v43_v3 = vld [vmem:[#allocation2 + $0x8] sm:$0xff]  ;;  %vm44_vm0 = vcmp.gt.f32.partialorder %v40_v0, 0.0  ;;  %vm45_vm1 = vcmp.gt.f32.partialorder %v41_v1, 0.0  ;;  %s66_s1 = sshll.u32 %s164_s6, 4  ;;  %s67_s1 = int_to_ptr.vmem [resolvable:$true] %s66_s1 }
  0x28   :  { %v46_v4 = vsub.f32 %v40_v0, %v42_v2  ;;  %v47_v5 = vsub.f32 %v41_v1, %v43_v3  ;;  %v79_v7 = vsel %vm44_vm0, 1.0, %v163_v6  ;;  %v80_v8 = vsel %vm45_vm1, 1.0, %v163_v6  ;;  %s131_s7 = scalar_lea.vmem %s67_s1, 256  ;;  %p136_p3 = scmp.lt.s32.totalorder %s67_s1, %s67_s1 }
  0x29   :  { %v58_v10 = vadd.f32 %v80_v8, %v79_v7  ;;  %p132_p2 = scmp.ne.s32.totalorder %s67_s1, %s131_s7  ;;  %p137_p4 = scmp.lt.s32.totalorder %s131_s7, %s131_s7 }
  0x2a   :  { %v48_v9 = vand.u32 2147483647, %v46_v4  ;;  %v49_v11 = vand.u32 2147483647, %v47_v5 }
  0x2b   :  { %60 = vst [vmem:[#allocation7 + $0x8] sm:$0xff] %v58_v10  ;;  %p138_p5 = por %p137_p4, %p136_p3 }
  0x2c   :  { %v50_v12 = vsel %vm44_vm0, %v48_v9, 0.0  ;;  %v51_v13 = vsel %vm45_vm1, %v49_v11, 0.0 }
  0x2d   :  { %v56_v14 = vadd.f32 %v51_v13, %v50_v12  ;;  %p139_p6 = pnand %p138_p5, %p132_p2 }
  0x2f   :  { %57 = vst [vmem:[#allocation7] sm:$0xff] %v56_v14 }
  0x30   :  { %142 = shalt.err (!%p139_p6)
}
  0x31   :  { %s143_s10 = scalar_lea.hbm %s227_s2, 256 }
  0x32   :  { %p144_p7 = scmp.ne.s32.totalorder %s227_s2, %s143_s10  ;;  %p147_p8 = scmp.lt.u32.totalorder %s143_s10, %s227_s2 }
  0x34   :  { %p149_p9 = pnand %p147_p8, %p144_p7 }
  0x36   :  { %152 = shalt.err (!%p149_p9)
}
  0x37   :  { %72 = dma.vmem_to_hbm [thread:$0]  %s67_s1, 256, %s227_s2, [#allocation4], %s160_s19, %s160_s19, %s161_s20  }
  0x38   :  { %157 = dma.done.wait [#allocation4], 256  }
  0x39   :  { %158 = vsyncadd [#allocation4], 4294967040 }
  0x3a   :  { %76 = vsyncpa [#allocation3], 1 }
  0x3b   :  { %77 = vsyncpa [#allocation6], 1 }
  0x3c   :  { %78 = vsyncpa [#allocation4], 1 }

</bundles_post_ra>
